<compile_context>
chip_gen: v6e
topology: v6e:2x2x1
jax: 0.10.0
libtpu: 0.0.40
codegen_flags: <defaults>
</compile_context>

<pallas_src>
import functools

import numpy as np

import jax
import jax.numpy as jnp
from jax import lax
from jax.experimental import pallas as pl
from jax.experimental.pallas import tpu as pltpu


_VMEM_BUDGET = 48 * 1024 * 1024   # conservative: fits v7x's 64 MiB per-TC VMEM


def _round_up(x, m):
    return ((x + m - 1) // m) * m


def prepare_tables(repr_table, emb_table_flat, dtype=None):
    """Optional one-time cast of the frozen pretrained tables (e.g. to
    bfloat16, halving HBM traffic for this pure-bandwidth gather)."""
    if dtype is not None:
        repr_table = repr_table.astype(dtype)
        emb_table_flat = emb_table_flat.astype(dtype)
    return repr_table, emb_table_flat


def _gather_rows_kernel(ids_ref, repr_hbm, emb_hbm, repr_out, emb_out, sem,
                        *, tile, unroll):
    """Gather `tile` table rows straight from HBM into the two pipelined
    output VMEM blocks (one row DMA per (id, table)).

    ids_ref  : SMEM int32 [n_pad]           (scalar-prefetched ids)
    repr_hbm : HBM        [vocab, h_dim]    (memory_space=pl.ANY)
    emb_hbm  : HBM        [vocab, e_dim]    (memory_space=pl.ANY)
    repr_out : VMEM       [tile, h_dim]     (pipelined output block)
    emb_out  : VMEM       [tile, e_dim]     (pipelined output block)
    sem      : DMA semaphores, shape (2,)
    """
    base = pl.program_id(0) * tile
    n_chunks = tile // unroll

    def issue_chunk(c, carry):
        first = c * unroll
        # Python-level unroll: descriptor pushes go back-to-back.  The kernel
        # has no compute, so the scalar/vector-misc issue slots are what
        # saturate when rows are small.
        for u in range(unroll):
            i = first + u
            row = ids_ref[base + i]
            pltpu.make_async_copy(
                repr_hbm.at[pl.ds(row, 1), :],
                repr_out.at[pl.ds(i, 1), :],
                sem.at[0]).start()
            pltpu.make_async_copy(
                emb_hbm.at[pl.ds(row, 1), :],
                emb_out.at[pl.ds(i, 1), :],
                sem.at[1]).start()
        return carry

    lax.fori_loop(0, n_chunks, issue_chunk, 0)

    # ONE aggregate wait per output: a wait's byte count comes from its
    # destination ref, and the whole block equals the sum of the `tile`
    # per-row copies issued on that semaphore.  (The src ref is unused by
    # .wait(); using the block itself keeps shapes/dtypes trivially valid.)
    pltpu.make_async_copy(repr_out, repr_out, sem.at[0]).wait()
    pltpu.make_async_copy(emb_out, emb_out, sem.at[1]).wait()


@functools.partial(jax.jit, static_argnames=("tile", "use_pallas"))
def pipeline_encoder_lookup(news_ids_flat, repr_table, emb_table_flat, *,
                            tile=128, use_pallas=None):
    """Gather one row per id from each frozen table.

    news_ids_flat : int32 [N]
    repr_table    : [vocab, hidden_dim]
    emb_table_flat: [vocab, emb_dim]
    Returns (repr_rows [N, hidden_dim], emb_rows [N, emb_dim]).
    """
    n = news_ids_flat.shape[0]
    vocab, h_dim = repr_table.shape
    vocab2, e_dim = emb_table_flat.shape
    assert vocab == vocab2, "table vocab sizes must match"

    itemsize = jnp.dtype(repr_table.dtype).itemsize
    row_bytes = (h_dim + e_dim) * itemsize

    if use_pallas is None:
        # Tiny rows are dominated by per-row DMA descriptor latency (XLA's
        # native gather wins); also bail out if even an 8-row block would not
        # fit double-buffered in the VMEM budget.
        use_pallas = (row_bytes >= 4096) and (2 * 8 * row_bytes <= _VMEM_BUDGET)

    # OOB safety: clamp ids into the valid row range (PyTorch would raise).
    ids = jnp.clip(news_ids_flat.astype(jnp.int32), 0, vocab - 1)

    if not use_pallas:
        return (jnp.take(repr_table, ids, axis=0),
                jnp.take(emb_table_flat, ids, axis=0))

    # ---- tile sizing from VMEM (both outputs, double-buffered) ----
    t_cap = max(8, (_VMEM_BUDGET // (2 * row_bytes)) // 8 * 8)
    t = int(min(tile, t_cap, _round_up(n, 8)))
    t = max(8, (t // 8) * 8)
    n_pad = _round_up(n, t)
    if n_pad != n:
        # Padded ids gather row 0 and are sliced off afterwards.
        ids = jnp.concatenate(
            [ids, jnp.zeros((n_pad - n,), dtype=jnp.int32)], axis=0)
    num_tiles = n_pad // t
    unroll = 8 if t % 8 == 0 else 1   # t is always a multiple of 8

    out_block_bytes = t * row_bytes
    vmem_limit = int(min(max(2 * out_block_bytes + (4 << 20), 16 << 20),
                         64 << 20))

    kernel = functools.partial(_gather_rows_kernel, tile=t, unroll=unroll)

    repr_rows, emb_rows = pl.pallas_call(
        kernel,
        out_shape=(jax.ShapeDtypeStruct((n_pad, h_dim), repr_table.dtype),
                   jax.ShapeDtypeStruct((n_pad, e_dim), emb_table_flat.dtype)),
        grid_spec=pltpu.PrefetchScalarGridSpec(
            num_scalar_prefetch=1,                          # ids -> SMEM
            grid=(num_tiles,),
            in_specs=[pl.BlockSpec(memory_space=pl.ANY),    # tables stay in HBM
                      pl.BlockSpec(memory_space=pl.ANY)],
            out_specs=(pl.BlockSpec((t, h_dim), lambda g, ids_ref: (g, 0)),
                       pl.BlockSpec((t, e_dim), lambda g, ids_ref: (g, 0))),
            scratch_shapes=[pltpu.SemaphoreType.DMA((2,))],
        ),
        compiler_params=pltpu.CompilerParams(
            # "parallel" vs "arbitrary" is near-neutral here; core-parallel
            # sharding only pays when descriptor-issue bound (small rows).
            dimension_semantics=("arbitrary",),
            vmem_limit_bytes=vmem_limit,
        ),
    )(ids, repr_table, emb_table_flat)

    if n_pad != n:
        repr_rows = repr_rows[:n]
        emb_rows = emb_rows[:n]
    return repr_rows, emb_rows


def pipeline_encoder_forward(news_batch, news_id, repr_table, emb_table_flat,
                             level, hidden_dim, *, dedup=True, tile=128,
                             use_pallas=None):
    """JAX/Pallas equivalent of Pipeline_Encoder.forward.

    news_batch: [batch, *, signal_length]  (only its shape is used, as in PyTorch)
    news_id   : int   [batch, *]
    Returns:
      news_embedding: [batch, *, signal_length, level, hidden_dim]
      news_repr     : [batch, *, hidden_dim]
    """
    signal_length = news_batch.shape[-1]
    emb_dim = signal_length * level * hidden_dim
    assert emb_table_flat.shape[-1] == emb_dim, "embedding table width mismatch"

    ids_flat = news_id.reshape(-1).astype(jnp.int32)

    if dedup:
        # News-rec batches repeat ids heavily: gather only unique rows, then
        # re-expand with a cheap on-device take.  The id array is tiny, so the
        # host-side np.unique sync is negligible next to the row gather.
        ids_np = np.asarray(jax.device_get(ids_flat))
        uniq_np, inv_np = np.unique(ids_np, return_inverse=True)
        uniq = jnp.asarray(uniq_np.astype(np.int32))
        inv = jnp.asarray(inv_np.reshape(-1).astype(np.int32))
        repr_u, emb_u = pipeline_encoder_lookup(
            uniq, repr_table, emb_table_flat, tile=tile, use_pallas=use_pallas)
        repr_rows = jnp.take(repr_u, inv, axis=0)
        emb_rows = jnp.take(emb_u, inv, axis=0)
    else:
        repr_rows, emb_rows = pipeline_encoder_lookup(
            ids_flat, repr_table, emb_table_flat, tile=tile,
            use_pallas=use_pallas)

    news_repr = repr_rows.reshape(news_id.shape + (hidden_dim,))
    news_embedding = emb_rows.reshape(news_batch.shape + (level, hidden_dim))
    return news_embedding, news_repr


if __name__ == "__main__":
    key = jax.random.PRNGKey(0)
    k_repr, k_emb, k_ids, k_batch = jax.random.split(key, 4)

    # Small synthetic shapes consistent with the module's forward.
    batch_size = 2
    num_cands = 3          # the "*" axis
    signal_length = 8
    level = 2
    hidden_dim = 32
    vocab = 16             # number of pre-encoded news items

    # Deterministic "pretrained" embedding tables (would be torch.load'ed).
    # TODO(synk): real deployments should call prepare_tables(..., jnp.bfloat16)
    # to halve HBM traffic; kept float32 here for exact reference comparison.
    repr_table = jax.random.normal(k_repr, (vocab, hidden_dim),
                                   dtype=jnp.float32)
    emb_table = jax.random.normal(
        k_emb, (vocab, signal_length, level, hidden_dim), dtype=jnp.float32)
    emb_table_flat = emb_table.reshape(vocab, -1)   # nn.Embedding.from_pretrained(view(V, -1))

    news_id = jax.random.randint(k_ids, (batch_size, num_cands), 0, vocab,
                                 dtype=jnp.int32)
    news_batch = jax.random.randint(
        k_batch, (batch_size, num_cands, signal_length), 0, 100,
        dtype=jnp.int32)

    # Force the Pallas path (test rows are tiny; auto-dispatch would fall back
    # to XLA's native gather for this regime).
    news_embedding, news_repr = pipeline_encoder_forward(
        news_batch, news_id, repr_table, emb_table_flat, level, hidden_dim,
        dedup=True, use_pallas=True)
    news_embedding = jax.block_until_ready(news_embedding)
    news_repr = jax.block_until_ready(news_repr)

    # Reference check against plain JAX gathers.
    ref_repr = repr_table[news_id]
    ref_emb = emb_table_flat[news_id].reshape(
        news_batch.shape + (level, hidden_dim))
    assert news_repr.shape == (batch_size, num_cands, hidden_dim)
    assert news_embedding.shape == (batch_size, num_cands, signal_length,
                                    level, hidden_dim)
    assert jnp.allclose(news_repr, ref_repr)
    assert jnp.allclose(news_embedding, ref_emb)

    # Also exercise the non-dedup Pallas path (gathers every id directly).
    ne2, nr2 = pipeline_encoder_forward(
        news_batch, news_id, repr_table, emb_table_flat, level, hidden_dim,
        dedup=False, use_pallas=True)
    assert jnp.allclose(jax.block_until_ready(nr2), ref_repr)
    assert jnp.allclose(jax.block_until_ready(ne2), ref_emb)

    print("KERNEL_OK")
</pallas_src>

<mosaic_0001>
module attributes {stable_mosaic.version = 11 : i64} {
  func.func @_gather_rows_kernel(%arg0: i32, %arg1: memref<8xi32, #tpu.memory_space<smem>>, %arg2: memref<16x32xf32, #tpu.memory_space<any>>, %arg3: memref<16x512xf32, #tpu.memory_space<any>>, %arg4: memref<8x32xf32, #tpu.memory_space<vmem>>, %arg5: memref<8x512xf32, #tpu.memory_space<vmem>>, %arg6: memref<2x!tpu.dma_semaphore, #tpu.memory_space<semaphore_mem>>) attributes {dimension_semantics = [#tpu.dimension_semantics<arbitrary>], iteration_bounds = array<i64: 1>, scalar_prefetch = 1 : i64, scratch_operands = 1 : i64, tpu.core_type = #tpu.core_type<tc>, window_params = [{}, {}, {transform_indices = @transform_2, window_bounds = array<i64: 8, 32>}, {transform_indices = @transform_3, window_bounds = array<i64: 8, 512>}]} {
    %c8_i32 = arith.constant 8 : i32
    %0 = arith.muli %arg0, %c8_i32 : i32
    %c0_i32 = arith.constant 0 : i32
    %c8_i32_0 = arith.constant 8 : i32
    %1 = arith.muli %c0_i32, %c8_i32_0 : i32
    %c0_i32_1 = arith.constant 0 : i32
    %2 = arith.addi %1, %c0_i32_1 : i32
    %3 = arith.addi %0, %2 : i32
    %4 = arith.index_cast %3 : i32 to index
    %5 = memref.load %arg1[%4] : memref<8xi32, #tpu.memory_space<smem>>
    %c0_i32_2 = arith.constant 0 : i32
    %c0_i32_3 = arith.constant 0 : i32
    %6 = tpu.memref_slice %arg2[%5, %c0_i32_3] : memref<16x32xf32, #tpu.memory_space<any>> -> memref<1x32xf32, #tpu.memory_space<any>>
    %c0_i32_4 = arith.constant 0 : i32
    %7 = tpu.memref_slice %arg4[%2, %c0_i32_4] : memref<8x32xf32, #tpu.memory_space<vmem>> -> memref<1x32xf32, #tpu.memory_space<vmem>>
    %8 = tpu.memref_slice %arg6[%c0_i32_2] : memref<2x!tpu.dma_semaphore, #tpu.memory_space<semaphore_mem>> -> memref<1x!tpu.dma_semaphore, #tpu.memory_space<semaphore_mem>>
    %9 = tpu.memref_squeeze %8 : memref<1x!tpu.dma_semaphore, #tpu.memory_space<semaphore_mem>> -> memref<!tpu.dma_semaphore, #tpu.memory_space<semaphore_mem>>
    tpu.enqueue_dma source(%6 : memref<1x32xf32, #tpu.memory_space<any>>) target(%7 : memref<1x32xf32, #tpu.memory_space<vmem>>) target_semaphore(%9 : memref<!tpu.dma_semaphore, #tpu.memory_space<semaphore_mem>>)
    %c1_i32 = arith.constant 1 : i32
    %c0_i32_5 = arith.constant 0 : i32
    %10 = tpu.memref_slice %arg3[%5, %c0_i32_5] : memref<16x512xf32, #tpu.memory_space<any>> -> memref<1x512xf32, #tpu.memory_space<any>>
    %c0_i32_6 = arith.constant 0 : i32
    %11 = tpu.memref_slice %arg5[%2, %c0_i32_6] : memref<8x512xf32, #tpu.memory_space<vmem>> -> memref<1x512xf32, #tpu.memory_space<vmem>>
    %12 = tpu.memref_slice %arg6[%c1_i32] : memref<2x!tpu.dma_semaphore, #tpu.memory_space<semaphore_mem>> -> memref<1x!tpu.dma_semaphore, #tpu.memory_space<semaphore_mem>>
    %13 = tpu.memref_squeeze %12 : memref<1x!tpu.dma_semaphore, #tpu.memory_space<semaphore_mem>> -> memref<!tpu.dma_semaphore, #tpu.memory_space<semaphore_mem>>
    tpu.enqueue_dma source(%10 : memref<1x512xf32, #tpu.memory_space<any>>) target(%11 : memref<1x512xf32, #tpu.memory_space<vmem>>) target_semaphore(%13 : memref<!tpu.dma_semaphore, #tpu.memory_space<semaphore_mem>>)
    %c1_i32_7 = arith.constant 1 : i32
    %14 = arith.addi %1, %c1_i32_7 : i32
    %15 = arith.addi %0, %14 : i32
    %16 = arith.index_cast %15 : i32 to index
    %17 = memref.load %arg1[%16] : memref<8xi32, #tpu.memory_space<smem>>
    %c0_i32_8 = arith.constant 0 : i32
    %c0_i32_9 = arith.constant 0 : i32
    %18 = tpu.memref_slice %arg2[%17, %c0_i32_9] : memref<16x32xf32, #tpu.memory_space<any>> -> memref<1x32xf32, #tpu.memory_space<any>>
    %c0_i32_10 = arith.constant 0 : i32
    %19 = tpu.memref_slice %arg4[%14, %c0_i32_10] : memref<8x32xf32, #tpu.memory_space<vmem>> -> memref<1x32xf32, #tpu.memory_space<vmem>>
    %20 = tpu.memref_slice %arg6[%c0_i32_8] : memref<2x!tpu.dma_semaphore, #tpu.memory_space<semaphore_mem>> -> memref<1x!tpu.dma_semaphore, #tpu.memory_space<semaphore_mem>>
    %21 = tpu.memref_squeeze %20 : memref<1x!tpu.dma_semaphore, #tpu.memory_space<semaphore_mem>> -> memref<!tpu.dma_semaphore, #tpu.memory_space<semaphore_mem>>
    tpu.enqueue_dma source(%18 : memref<1x32xf32, #tpu.memory_space<any>>) target(%19 : memref<1x32xf32, #tpu.memory_space<vmem>>) target_semaphore(%21 : memref<!tpu.dma_semaphore, #tpu.memory_space<semaphore_mem>>)
    %c1_i32_11 = arith.constant 1 : i32
    %c0_i32_12 = arith.constant 0 : i32
    %22 = tpu.memref_slice %arg3[%17, %c0_i32_12] : memref<16x512xf32, #tpu.memory_space<any>> -> memref<1x512xf32, #tpu.memory_space<any>>
    %c0_i32_13 = arith.constant 0 : i32
    %23 = tpu.memref_slice %arg5[%14, %c0_i32_13] : memref<8x512xf32, #tpu.memory_space<vmem>> -> memref<1x512xf32, #tpu.memory_space<vmem>>
    %24 = tpu.memref_slice %arg6[%c1_i32_11] : memref<2x!tpu.dma_semaphore, #tpu.memory_space<semaphore_mem>> -> memref<1x!tpu.dma_semaphore, #tpu.memory_space<semaphore_mem>>
    %25 = tpu.memref_squeeze %24 : memref<1x!tpu.dma_semaphore, #tpu.memory_space<semaphore_mem>> -> memref<!tpu.dma_semaphore, #tpu.memory_space<semaphore_mem>>
    tpu.enqueue_dma source(%22 : memref<1x512xf32, #tpu.memory_space<any>>) target(%23 : memref<1x512xf32, #tpu.memory_space<vmem>>) target_semaphore(%25 : memref<!tpu.dma_semaphore, #tpu.memory_space<semaphore_mem>>)
    %c2_i32 = arith.constant 2 : i32
    %26 = arith.addi %1, %c2_i32 : i32
    %27 = arith.addi %0, %26 : i32
    %28 = arith.index_cast %27 : i32 to index
    %29 = memref.load %arg1[%28] : memref<8xi32, #tpu.memory_space<smem>>
    %c0_i32_14 = arith.constant 0 : i32
    %c0_i32_15 = arith.constant 0 : i32
    %30 = tpu.memref_slice %arg2[%29, %c0_i32_15] : memref<16x32xf32, #tpu.memory_space<any>> -> memref<1x32xf32, #tpu.memory_space<any>>
    %c0_i32_16 = arith.constant 0 : i32
    %31 = tpu.memref_slice %arg4[%26, %c0_i32_16] : memref<8x32xf32, #tpu.memory_space<vmem>> -> memref<1x32xf32, #tpu.memory_space<vmem>>
    %32 = tpu.memref_slice %arg6[%c0_i32_14] : memref<2x!tpu.dma_semaphore, #tpu.memory_space<semaphore_mem>> -> memref<1x!tpu.dma_semaphore, #tpu.memory_space<semaphore_mem>>
    %33 = tpu.memref_squeeze %32 : memref<1x!tpu.dma_semaphore, #tpu.memory_space<semaphore_mem>> -> memref<!tpu.dma_semaphore, #tpu.memory_space<semaphore_mem>>
    tpu.enqueue_dma source(%30 : memref<1x32xf32, #tpu.memory_space<any>>) target(%31 : memref<1x32xf32, #tpu.memory_space<vmem>>) target_semaphore(%33 : memref<!tpu.dma_semaphore, #tpu.memory_space<semaphore_mem>>)
    %c1_i32_17 = arith.constant 1 : i32
    %c0_i32_18 = arith.constant 0 : i32
    %34 = tpu.memref_slice %arg3[%29, %c0_i32_18] : memref<16x512xf32, #tpu.memory_space<any>> -> memref<1x512xf32, #tpu.memory_space<any>>
    %c0_i32_19 = arith.constant 0 : i32
    %35 = tpu.memref_slice %arg5[%26, %c0_i32_19] : memref<8x512xf32, #tpu.memory_space<vmem>> -> memref<1x512xf32, #tpu.memory_space<vmem>>
    %36 = tpu.memref_slice %arg6[%c1_i32_17] : memref<2x!tpu.dma_semaphore, #tpu.memory_space<semaphore_mem>> -> memref<1x!tpu.dma_semaphore, #tpu.memory_space<semaphore_mem>>
    %37 = tpu.memref_squeeze %36 : memref<1x!tpu.dma_semaphore, #tpu.memory_space<semaphore_mem>> -> memref<!tpu.dma_semaphore, #tpu.memory_space<semaphore_mem>>
    tpu.enqueue_dma source(%34 : memref<1x512xf32, #tpu.memory_space<any>>) target(%35 : memref<1x512xf32, #tpu.memory_space<vmem>>) target_semaphore(%37 : memref<!tpu.dma_semaphore, #tpu.memory_space<semaphore_mem>>)
    %c3_i32 = arith.constant 3 : i32
    %38 = arith.addi %1, %c3_i32 : i32
    %39 = arith.addi %0, %38 : i32
    %40 = arith.index_cast %39 : i32 to index
    %41 = memref.load %arg1[%40] : memref<8xi32, #tpu.memory_space<smem>>
    %c0_i32_20 = arith.constant 0 : i32
    %c0_i32_21 = arith.constant 0 : i32
    %42 = tpu.memref_slice %arg2[%41, %c0_i32_21] : memref<16x32xf32, #tpu.memory_space<any>> -> memref<1x32xf32, #tpu.memory_space<any>>
    %c0_i32_22 = arith.constant 0 : i32
    %43 = tpu.memref_slice %arg4[%38, %c0_i32_22] : memref<8x32xf32, #tpu.memory_space<vmem>> -> memref<1x32xf32, #tpu.memory_space<vmem>>
    %44 = tpu.memref_slice %arg6[%c0_i32_20] : memref<2x!tpu.dma_semaphore, #tpu.memory_space<semaphore_mem>> -> memref<1x!tpu.dma_semaphore, #tpu.memory_space<semaphore_mem>>
    %45 = tpu.memref_squeeze %44 : memref<1x!tpu.dma_semaphore, #tpu.memory_space<semaphore_mem>> -> memref<!tpu.dma_semaphore, #tpu.memory_space<semaphore_mem>>
    tpu.enqueue_dma source(%42 : memref<1x32xf32, #tpu.memory_space<any>>) target(%43 : memref<1x32xf32, #tpu.memory_space<vmem>>) target_semaphore(%45 : memref<!tpu.dma_semaphore, #tpu.memory_space<semaphore_mem>>)
    %c1_i32_23 = arith.constant 1 : i32
    %c0_i32_24 = arith.constant 0 : i32
    %46 = tpu.memref_slice %arg3[%41, %c0_i32_24] : memref<16x512xf32, #tpu.memory_space<any>> -> memref<1x512xf32, #tpu.memory_space<any>>
    %c0_i32_25 = arith.constant 0 : i32
    %47 = tpu.memref_slice %arg5[%38, %c0_i32_25] : memref<8x512xf32, #tpu.memory_space<vmem>> -> memref<1x512xf32, #tpu.memory_space<vmem>>
    %48 = tpu.memref_slice %arg6[%c1_i32_23] : memref<2x!tpu.dma_semaphore, #tpu.memory_space<semaphore_mem>> -> memref<1x!tpu.dma_semaphore, #tpu.memory_space<semaphore_mem>>
    %49 = tpu.memref_squeeze %48 : memref<1x!tpu.dma_semaphore, #tpu.memory_space<semaphore_mem>> -> memref<!tpu.dma_semaphore, #tpu.memory_space<semaphore_mem>>
    tpu.enqueue_dma source(%46 : memref<1x512xf32, #tpu.memory_space<any>>) target(%47 : memref<1x512xf32, #tpu.memory_space<vmem>>) target_semaphore(%49 : memref<!tpu.dma_semaphore, #tpu.memory_space<semaphore_mem>>)
    %c4_i32 = arith.constant 4 : i32
    %50 = arith.addi %1, %c4_i32 : i32
    %51 = arith.addi %0, %50 : i32
    %52 = arith.index_cast %51 : i32 to index
    %53 = memref.load %arg1[%52] : memref<8xi32, #tpu.memory_space<smem>>
    %c0_i32_26 = arith.constant 0 : i32
    %c0_i32_27 = arith.constant 0 : i32
    %54 = tpu.memref_slice %arg2[%53, %c0_i32_27] : memref<16x32xf32, #tpu.memory_space<any>> -> memref<1x32xf32, #tpu.memory_space<any>>
    %c0_i32_28 = arith.constant 0 : i32
    %55 = tpu.memref_slice %arg4[%50, %c0_i32_28] : memref<8x32xf32, #tpu.memory_space<vmem>> -> memref<1x32xf32, #tpu.memory_space<vmem>>
    %56 = tpu.memref_slice %arg6[%c0_i32_26] : memref<2x!tpu.dma_semaphore, #tpu.memory_space<semaphore_mem>> -> memref<1x!tpu.dma_semaphore, #tpu.memory_space<semaphore_mem>>
    %57 = tpu.memref_squeeze %56 : memref<1x!tpu.dma_semaphore, #tpu.memory_space<semaphore_mem>> -> memref<!tpu.dma_semaphore, #tpu.memory_space<semaphore_mem>>
    tpu.enqueue_dma source(%54 : memref<1x32xf32, #tpu.memory_space<any>>) target(%55 : memref<1x32xf32, #tpu.memory_space<vmem>>) target_semaphore(%57 : memref<!tpu.dma_semaphore, #tpu.memory_space<semaphore_mem>>)
    %c1_i32_29 = arith.constant 1 : i32
    %c0_i32_30 = arith.constant 0 : i32
    %58 = tpu.memref_slice %arg3[%53, %c0_i32_30] : memref<16x512xf32, #tpu.memory_space<any>> -> memref<1x512xf32, #tpu.memory_space<any>>
    %c0_i32_31 = arith.constant 0 : i32
    %59 = tpu.memref_slice %arg5[%50, %c0_i32_31] : memref<8x512xf32, #tpu.memory_space<vmem>> -> memref<1x512xf32, #tpu.memory_space<vmem>>
    %60 = tpu.memref_slice %arg6[%c1_i32_29] : memref<2x!tpu.dma_semaphore, #tpu.memory_space<semaphore_mem>> -> memref<1x!tpu.dma_semaphore, #tpu.memory_space<semaphore_mem>>
    %61 = tpu.memref_squeeze %60 : memref<1x!tpu.dma_semaphore, #tpu.memory_space<semaphore_mem>> -> memref<!tpu.dma_semaphore, #tpu.memory_space<semaphore_mem>>
    tpu.enqueue_dma source(%58 : memref<1x512xf32, #tpu.memory_space<any>>) target(%59 : memref<1x512xf32, #tpu.memory_space<vmem>>) target_semaphore(%61 : memref<!tpu.dma_semaphore, #tpu.memory_space<semaphore_mem>>)
    %c5_i32 = arith.constant 5 : i32
    %62 = arith.addi %1, %c5_i32 : i32
    %63 = arith.addi %0, %62 : i32
    %64 = arith.index_cast %63 : i32 to index
    %65 = memref.load %arg1[%64] : memref<8xi32, #tpu.memory_space<smem>>
    %c0_i32_32 = arith.constant 0 : i32
    %c0_i32_33 = arith.constant 0 : i32
    %66 = tpu.memref_slice %arg2[%65, %c0_i32_33] : memref<16x32xf32, #tpu.memory_space<any>> -> memref<1x32xf32, #tpu.memory_space<any>>
    %c0_i32_34 = arith.constant 0 : i32
    %67 = tpu.memref_slice %arg4[%62, %c0_i32_34] : memref<8x32xf32, #tpu.memory_space<vmem>> -> memref<1x32xf32, #tpu.memory_space<vmem>>
    %68 = tpu.memref_slice %arg6[%c0_i32_32] : memref<2x!tpu.dma_semaphore, #tpu.memory_space<semaphore_mem>> -> memref<1x!tpu.dma_semaphore, #tpu.memory_space<semaphore_mem>>
    %69 = tpu.memref_squeeze %68 : memref<1x!tpu.dma_semaphore, #tpu.memory_space<semaphore_mem>> -> memref<!tpu.dma_semaphore, #tpu.memory_space<semaphore_mem>>
    tpu.enqueue_dma source(%66 : memref<1x32xf32, #tpu.memory_space<any>>) target(%67 : memref<1x32xf32, #tpu.memory_space<vmem>>) target_semaphore(%69 : memref<!tpu.dma_semaphore, #tpu.memory_space<semaphore_mem>>)
    %c1_i32_35 = arith.constant 1 : i32
    %c0_i32_36 = arith.constant 0 : i32
    %70 = tpu.memref_slice %arg3[%65, %c0_i32_36] : memref<16x512xf32, #tpu.memory_space<any>> -> memref<1x512xf32, #tpu.memory_space<any>>
    %c0_i32_37 = arith.constant 0 : i32
    %71 = tpu.memref_slice %arg5[%62, %c0_i32_37] : memref<8x512xf32, #tpu.memory_space<vmem>> -> memref<1x512xf32, #tpu.memory_space<vmem>>
    %72 = tpu.memref_slice %arg6[%c1_i32_35] : memref<2x!tpu.dma_semaphore, #tpu.memory_space<semaphore_mem>> -> memref<1x!tpu.dma_semaphore, #tpu.memory_space<semaphore_mem>>
    %73 = tpu.memref_squeeze %72 : memref<1x!tpu.dma_semaphore, #tpu.memory_space<semaphore_mem>> -> memref<!tpu.dma_semaphore, #tpu.memory_space<semaphore_mem>>
    tpu.enqueue_dma source(%70 : memref<1x512xf32, #tpu.memory_space<any>>) target(%71 : memref<1x512xf32, #tpu.memory_space<vmem>>) target_semaphore(%73 : memref<!tpu.dma_semaphore, #tpu.memory_space<semaphore_mem>>)
    %c6_i32 = arith.constant 6 : i32
    %74 = arith.addi %1, %c6_i32 : i32
    %75 = arith.addi %0, %74 : i32
    %76 = arith.index_cast %75 : i32 to index
    %77 = memref.load %arg1[%76] : memref<8xi32, #tpu.memory_space<smem>>
    %c0_i32_38 = arith.constant 0 : i32
    %c0_i32_39 = arith.constant 0 : i32
    %78 = tpu.memref_slice %arg2[%77, %c0_i32_39] : memref<16x32xf32, #tpu.memory_space<any>> -> memref<1x32xf32, #tpu.memory_space<any>>
    %c0_i32_40 = arith.constant 0 : i32
    %79 = tpu.memref_slice %arg4[%74, %c0_i32_40] : memref<8x32xf32, #tpu.memory_space<vmem>> -> memref<1x32xf32, #tpu.memory_space<vmem>>
    %80 = tpu.memref_slice %arg6[%c0_i32_38] : memref<2x!tpu.dma_semaphore, #tpu.memory_space<semaphore_mem>> -> memref<1x!tpu.dma_semaphore, #tpu.memory_space<semaphore_mem>>
    %81 = tpu.memref_squeeze %80 : memref<1x!tpu.dma_semaphore, #tpu.memory_space<semaphore_mem>> -> memref<!tpu.dma_semaphore, #tpu.memory_space<semaphore_mem>>
    tpu.enqueue_dma source(%78 : memref<1x32xf32, #tpu.memory_space<any>>) target(%79 : memref<1x32xf32, #tpu.memory_space<vmem>>) target_semaphore(%81 : memref<!tpu.dma_semaphore, #tpu.memory_space<semaphore_mem>>)
    %c1_i32_41 = arith.constant 1 : i32
    %c0_i32_42 = arith.constant 0 : i32
    %82 = tpu.memref_slice %arg3[%77, %c0_i32_42] : memref<16x512xf32, #tpu.memory_space<any>> -> memref<1x512xf32, #tpu.memory_space<any>>
    %c0_i32_43 = arith.constant 0 : i32
    %83 = tpu.memref_slice %arg5[%74, %c0_i32_43] : memref<8x512xf32, #tpu.memory_space<vmem>> -> memref<1x512xf32, #tpu.memory_space<vmem>>
    %84 = tpu.memref_slice %arg6[%c1_i32_41] : memref<2x!tpu.dma_semaphore, #tpu.memory_space<semaphore_mem>> -> memref<1x!tpu.dma_semaphore, #tpu.memory_space<semaphore_mem>>
    %85 = tpu.memref_squeeze %84 : memref<1x!tpu.dma_semaphore, #tpu.memory_space<semaphore_mem>> -> memref<!tpu.dma_semaphore, #tpu.memory_space<semaphore_mem>>
    tpu.enqueue_dma source(%82 : memref<1x512xf32, #tpu.memory_space<any>>) target(%83 : memref<1x512xf32, #tpu.memory_space<vmem>>) target_semaphore(%85 : memref<!tpu.dma_semaphore, #tpu.memory_space<semaphore_mem>>)
    %c7_i32 = arith.constant 7 : i32
    %86 = arith.addi %1, %c7_i32 : i32
    %87 = arith.addi %0, %86 : i32
    %88 = arith.index_cast %87 : i32 to index
    %89 = memref.load %arg1[%88] : memref<8xi32, #tpu.memory_space<smem>>
    %c0_i32_44 = arith.constant 0 : i32
    %c0_i32_45 = arith.constant 0 : i32
    %90 = tpu.memref_slice %arg2[%89, %c0_i32_45] : memref<16x32xf32, #tpu.memory_space<any>> -> memref<1x32xf32, #tpu.memory_space<any>>
    %c0_i32_46 = arith.constant 0 : i32
    %91 = tpu.memref_slice %arg4[%86, %c0_i32_46] : memref<8x32xf32, #tpu.memory_space<vmem>> -> memref<1x32xf32, #tpu.memory_space<vmem>>
    %92 = tpu.memref_slice %arg6[%c0_i32_44] : memref<2x!tpu.dma_semaphore, #tpu.memory_space<semaphore_mem>> -> memref<1x!tpu.dma_semaphore, #tpu.memory_space<semaphore_mem>>
    %93 = tpu.memref_squeeze %92 : memref<1x!tpu.dma_semaphore, #tpu.memory_space<semaphore_mem>> -> memref<!tpu.dma_semaphore, #tpu.memory_space<semaphore_mem>>
    tpu.enqueue_dma source(%90 : memref<1x32xf32, #tpu.memory_space<any>>) target(%91 : memref<1x32xf32, #tpu.memory_space<vmem>>) target_semaphore(%93 : memref<!tpu.dma_semaphore, #tpu.memory_space<semaphore_mem>>)
    %c1_i32_47 = arith.constant 1 : i32
    %c0_i32_48 = arith.constant 0 : i32
    %94 = tpu.memref_slice %arg3[%89, %c0_i32_48] : memref<16x512xf32, #tpu.memory_space<any>> -> memref<1x512xf32, #tpu.memory_space<any>>
    %c0_i32_49 = arith.constant 0 : i32
    %95 = tpu.memref_slice %arg5[%86, %c0_i32_49] : memref<8x512xf32, #tpu.memory_space<vmem>> -> memref<1x512xf32, #tpu.memory_space<vmem>>
    %96 = tpu.memref_slice %arg6[%c1_i32_47] : memref<2x!tpu.dma_semaphore, #tpu.memory_space<semaphore_mem>> -> memref<1x!tpu.dma_semaphore, #tpu.memory_space<semaphore_mem>>
    %97 = tpu.memref_squeeze %96 : memref<1x!tpu.dma_semaphore, #tpu.memory_space<semaphore_mem>> -> memref<!tpu.dma_semaphore, #tpu.memory_space<semaphore_mem>>
    tpu.enqueue_dma source(%94 : memref<1x512xf32, #tpu.memory_space<any>>) target(%95 : memref<1x512xf32, #tpu.memory_space<vmem>>) target_semaphore(%97 : memref<!tpu.dma_semaphore, #tpu.memory_space<semaphore_mem>>)
    %c1_i32_50 = arith.constant 1 : i32
    %c0_i32_51 = arith.constant 0 : i32
    %98 = tpu.memref_slice %arg6[%c0_i32_51] : memref<2x!tpu.dma_semaphore, #tpu.memory_space<semaphore_mem>> -> memref<1x!tpu.dma_semaphore, #tpu.memory_space<semaphore_mem>>
    %99 = tpu.memref_squeeze %98 : memref<1x!tpu.dma_semaphore, #tpu.memory_space<semaphore_mem>> -> memref<!tpu.dma_semaphore, #tpu.memory_space<semaphore_mem>>
    tpu.wait_dma2 semaphore(%99 : memref<!tpu.dma_semaphore, #tpu.memory_space<semaphore_mem>>) src(%arg4 : memref<8x32xf32, #tpu.memory_space<vmem>>) dst(%arg4 : memref<8x32xf32, #tpu.memory_space<vmem>>)
    %c1_i32_52 = arith.constant 1 : i32
    %100 = tpu.memref_slice %arg6[%c1_i32_52] : memref<2x!tpu.dma_semaphore, #tpu.memory_space<semaphore_mem>> -> memref<1x!tpu.dma_semaphore, #tpu.memory_space<semaphore_mem>>
    %101 = tpu.memref_squeeze %100 : memref<1x!tpu.dma_semaphore, #tpu.memory_space<semaphore_mem>> -> memref<!tpu.dma_semaphore, #tpu.memory_space<semaphore_mem>>
    tpu.wait_dma2 semaphore(%101 : memref<!tpu.dma_semaphore, #tpu.memory_space<semaphore_mem>>) src(%arg5 : memref<8x512xf32, #tpu.memory_space<vmem>>) dst(%arg5 : memref<8x512xf32, #tpu.memory_space<vmem>>)
    return
  }
  func.func @transform_2(%arg0: i32, %arg1: memref<8xi32, #tpu.memory_space<smem>>) -> (i32, i32) {
    %c0_i32 = arith.constant 0 : i32
    %c0_i32_0 = arith.constant 0 : i32
    return %arg0, %c0_i32 : i32, i32
  }
  func.func @transform_3(%arg0: i32, %arg1: memref<8xi32, #tpu.memory_space<smem>>) -> (i32, i32) {
    %c0_i32 = arith.constant 0 : i32
    %c0_i32_0 = arith.constant 0 : i32
    return %arg0, %c0_i32 : i32, i32
  }
}

</mosaic_0001>

<bundles_post_ra>
// kernel: pipeline_encoder_lookup.1
= control target key start
LH: loop header
LB: loop body
LE: loop exit
PB: predicated region body
PF: predicated region fallthrough
CT: control target
= control target key end

     0   :  { %s1172_s0 = inlined_call_operand.vmem [shape: s32[8], index: 0, kind: input, shape index: {}]   ;;  %s1173_s1 = inlined_call_operand.hbm [shape: f32[16,32], index: 1, kind: input, shape index: {}]   ;;  %s1174_s2 = inlined_call_operand.hbm [shape: f32[16,512], index: 2, kind: input, shape index: {}]   ;;  %s1175_s3 = inlined_call_operand.hbm [shape: f32[8,32], index: 3, kind: output, shape index: {0}]   ;;  %s1176_s4 = inlined_call_operand.hbm [shape: f32[8,512], index: 4, kind: output, shape index: {1}]  }
   0x1   :  { %s10_s17 = sshll.u32 %s1172_s0, 4  ;;  %s11_s17 = int_to_ptr.vmem [resolvable:$true] %s10_s17 }
   0x2   :  { %s388_s18 = scalar_lea.vmem %s11_s17, 16  ;;  %p393_p1 = scmp.lt.s32.totalorder %s11_s17, %s11_s17 }
   0x3   :  { %p389_p0 = scmp.ne.s32.totalorder %s11_s17, %s388_s18  ;;  %p394_p2 = scmp.lt.s32.totalorder %s388_s18, %s388_s18 }
   0x5   :  { %p395_p3 = por %p394_p2, %p393_p1 }
   0x7   :  { %p396_p4 = pnand %p395_p3, %p389_p0 }
   0x9   :  { %399 = shalt.err (!%p396_p4)  }
   0xa   :  { %s802_s19 = smov [#allocation4]  }
   0xb   :  { %13 = dma.vmem_to_smem %s11_s17, 16, %s802_s19, [#allocation3] }
   0xc   :  { %792 = dma.done.wait [#allocation3], 16 }
   0xd   :  { %793 = vsyncadd [#allocation3], 4294967280 }
   0xe   :  { %15 = sfence }
   0xf   :  { %16 = vsyncpa [#allocation6], 0 }
  0x10   :  { %17 = vsyncpa [#allocation8], 0  ;;  %s849_s20 = sld [smem:[#allocation4]]  ;;  %s803_s0 = smov [#allocation5]  }
  0x11   :  { %s29_s21 = sshll.u32 %s803_s0, 4  ;;  %s804_s22 = smov [#allocation7]   ;;  %s851_s21 = int_to_ptr.vmem [resolvable:$true] %s29_s21 }
  0x12   :  { %s41_s23 = sshll.u32 %s804_s22, 4  ;;  %s855_s24 = sld [smem:[#allocation4 + $0x1]]  ;;  %s853_s23 = int_to_ptr.vmem [resolvable:$true] %s41_s23 }
  0x13   :  { %s866_s8 = scalar_lea.hbm %s1173_s1, 256 }
  0x16   :  { %s336_s25 = sshll.u32 %s849_s20, 4  ;;  %s33_s26 = sshrl.u32 %s849_s20, 3 }
  0x17   :  { %s21_s29 = scalar_lea.hbm %s1173_s1, %s336_s25  ;;  %s34_s30 = sand.u32 7, %s849_s20  }
  0x18   :  { %s400_s5 = scalar_lea.hbm %s21_s29, 16  ;;  %p403_p6 = scmp.lt.s32.totalorder %s21_s29, %s1173_s1 }
  0x19   :  { %p401_p5 = scmp.ne.s32.totalorder %s21_s29, %s400_s5  ;;  %p404_p7 = scmp.lt.s32.totalorder %s866_s8, %s400_s5 }
  0x1b   :  { %p405_p8 = por %p404_p7, %p403_p6 }
  0x1d   :  { %p406_p9 = pnand %p405_p8, %p401_p5 }
  0x1f   :  { %409 = shalt.err (!%p406_p9)  }
  0x20   :  { %s410_s11 = scalar_lea.vmem %s851_s21, 16  ;;  %s875_s12 = scalar_lea.vmem %s851_s21, 128 }
  0x21   :  { %p411_p10 = scmp.ne.s32.totalorder %s851_s21, %s410_s11  ;;  %p415_p11 = scmp.lt.s32.totalorder %s851_s21, %s851_s21 }
  0x22   :  { %p416_p12 = scmp.lt.s32.totalorder %s875_s12, %s410_s11 }
  0x24   :  { %p417_p13 = por %p416_p12, %p415_p11 }
  0x26   :  { %p418_p0 = pnand %p417_p13, %p411_p10 }
  0x28   :  { %421 = shalt.err (!%p418_p0)  }
  0x29   :  { %32 = dma.hbm_to_vmem [thread:$0]  %s21_s29, 16, %s851_s21, [#allocation2] }
  0x2a   :  { %s337_s13 = sshll.u32 %s33_s26, 5  ;;  %s805_s14 = smov [#allocation5 + $0x1]  }
  0x2b   :  { %s57_s15 = sshll.u32 %s805_s14, 4  ;;  %s36_s16 = sadd.s32 %s337_s13, %s34_s30  ;;  %s893_s15 = int_to_ptr.vmem [resolvable:$true] %s57_s15 }
  0x2c   :  { %s340_s17 = sshll.u32 %s855_s24, 4  ;;  %s338_s18 = sshll.u32 %s36_s16, 4 }
  0x2d   :  { %s888_s0 = scalar_lea.hbm %s1173_s1, %s340_s17  ;;  %s38_s27 = scalar_lea.hbm %s1174_s2, %s338_s18 }
  0x2e   :  { %s422_s28 = scalar_lea.hbm %s38_s27, 64  ;;  %s898_s5 = scalar_lea.hbm %s1174_s2, 1024 }
  0x2f   :  { %p423_p1 = scmp.ne.s32.totalorder %s38_s27, %s422_s28  ;;  %p425_p2 = scmp.lt.s32.totalorder %s38_s27, %s1174_s2 }
  0x30   :  { %p426_p3 = scmp.lt.s32.totalorder %s898_s5, %s422_s28 }
  0x32   :  { %p427_p4 = por %p426_p3, %p425_p2 }
  0x34   :  { %p428_p5 = pnand %p427_p4, %p423_p1 }
  0x36   :  { %431 = shalt.err (!%p428_p5)  }
  0x37   :  { %s432_s7 = scalar_lea.vmem %s853_s23, 64  ;;  %s907_s9 = scalar_lea.vmem %s853_s23, 512 }
  0x38   :  { %p433_p6 = scmp.ne.s32.totalorder %s853_s23, %s432_s7  ;;  %p437_p7 = scmp.lt.s32.totalorder %s853_s23, %s853_s23 }
  0x39   :  { %p438_p8 = scmp.lt.s32.totalorder %s907_s9, %s432_s7 }
  0x3b   :  { %p439_p9 = por %p438_p8, %p437_p7 }
  0x3d   :  { %p440_p10 = pnand %p439_p9, %p433_p6 }
  0x3f   :  { %443 = shalt.err (!%p440_p10)  }
  0x40   :  { %s1177_s10 = smov 128   ;;  %s807_s11 = smov 1  }
  0x41   :  { %44 = dma.hbm_to_vmem [thread:$0]  %s38_s27, 64, %s853_s23, [#allocation2 + $0x1], %s1177_s10, %s1177_s10, %s807_s11 }
  0x42   :  { %s444_s13 = scalar_lea.hbm %s888_s0, 16  ;;  %p447_p13 = scmp.lt.s32.totalorder %s888_s0, %s1173_s1 }
  0x43   :  { %p445_p12 = scmp.ne.s32.totalorder %s888_s0, %s444_s13  ;;  %p448_p0 = scmp.lt.s32.totalorder %s866_s8, %s444_s13 }
  0x45   :  { %p449_p1 = por %p448_p0, %p447_p13 }
  0x47   :  { %p450_p2 = pnand %p449_p1, %p445_p12 }
  0x49   :  { %453 = shalt.err (!%p450_p2)  }
  0x4a   :  { %s454_s17 = scalar_lea.vmem %s893_s15, 16  ;;  %p459_p4 = scmp.lt.s32.totalorder %s893_s15, %s851_s21 }
  0x4b   :  { %p455_p3 = scmp.ne.s32.totalorder %s893_s15, %s454_s17  ;;  %p460_p5 = scmp.lt.s32.totalorder %s875_s12, %s454_s17 }
  0x4d   :  { %p461_p6 = por %p460_p5, %p459_p4 }
  0x4f   :  { %p462_p8 = pnand %p461_p6, %p455_p3 }
  0x51   :  { %465 = shalt.err (!%p462_p8)  }
  0x52   :  { %60 = dma.hbm_to_vmem [thread:$0]  %s888_s0, 16, %s893_s15, [#allocation2] }
  0x53   :  { %s61_s18 = sshrl.u32 %s855_s24, 3  ;;  %s62_s19 = sand.u32 7, %s855_s24  }
  0x54   :  { %s341_s20 = sshll.u32 %s61_s18, 5  ;;  %s808_s22 = smov [#allocation7 + $0x1]  }
  0x55   :  { %s69_s25 = sshll.u32 %s808_s22, 4  ;;  %s64_s27 = sadd.s32 %s341_s20, %s62_s19  ;;  %s70_s25 = int_to_ptr.vmem [resolvable:$true] %s69_s25 }
  0x56   :  { %s342_s28 = sshll.u32 %s64_s27, 4  ;;  %s935_s29 = sld [smem:[#allocation4 + $0x2]] }
  0x57   :  { %s66_s6 = scalar_lea.hbm %s1174_s2, %s342_s28 }
  0x58   :  { %s466_s7 = scalar_lea.hbm %s66_s6, 64  ;;  %p469_p10 = scmp.lt.s32.totalorder %s66_s6, %s1174_s2 }
  0x59   :  { %p467_p9 = scmp.ne.s32.totalorder %s66_s6, %s466_s7  ;;  %p470_p12 = scmp.lt.s32.totalorder %s898_s5, %s466_s7 }
  0x5b   :  { %p471_p13 = por %p470_p12, %p469_p10 }
  0x5d   :  { %p472_p0 = pnand %p471_p13, %p467_p9 }
  0x5f   :  { %475 = shalt.err (!%p472_p0)  }
  0x60   :  { %s476_s24 = scalar_lea.vmem %s70_s25, 64  ;;  %p481_p2 = scmp.lt.s32.totalorder %s70_s25, %s853_s23 }
  0x61   :  { %p477_p1 = scmp.ne.s32.totalorder %s70_s25, %s476_s24  ;;  %p482_p3 = scmp.lt.s32.totalorder %s907_s9, %s476_s24 }
  0x63   :  { %p483_p4 = por %p482_p3, %p481_p2 }
  0x65   :  { %p484_p5 = pnand %p483_p4, %p477_p1 }
  0x67   :  { %487 = shalt.err (!%p484_p5)  }
  0x68   :  { %72 = dma.hbm_to_vmem [thread:$0]  %s66_s6, 64, %s70_s25, [#allocation2 + $0x1], %s1177_s10, %s1177_s10, %s807_s11 }
  0x69   :  { %s809_s15 = smov [#allocation5 + $0x2]   ;;  %s810_s16 = smov [#allocation7 + $0x2]  }
  0x6a   :  { %s85_s0 = sshll.u32 %s809_s15, 4  ;;  %s97_s17 = sshll.u32 %s810_s16, 4  ;;  %s86_s0 = int_to_ptr.vmem [resolvable:$true] %s85_s0  ;;  %s949_s17 = int_to_ptr.vmem [resolvable:$true] %s97_s17 }
  0x6b   :  { %s951_s18 = sld [smem:[#allocation4 + $0x3]]  ;;  %s344_s19 = sshll.u32 %s935_s29, 4 }
  0x6c   :  { %s89_s20 = sshrl.u32 %s935_s29, 3  ;;  %s76_s28 = scalar_lea.hbm %s1173_s1, %s344_s19 }
  0x6d   :  { %s90_s26 = sand.u32 7, %s935_s29   ;;  %s488_s30 = scalar_lea.hbm %s76_s28, 16 }
  0x6e   :  { %p489_p6 = scmp.ne.s32.totalorder %s76_s28, %s488_s30  ;;  %p491_p8 = scmp.lt.s32.totalorder %s76_s28, %s1173_s1 }
  0x6f   :  { %p492_p9 = scmp.lt.s32.totalorder %s866_s8, %s488_s30 }
  0x71   :  { %p493_p10 = por %p492_p9, %p491_p8 }
  0x73   :  { %p494_p12 = pnand %p493_p10, %p489_p6 }
  0x75   :  { %497 = shalt.err (!%p494_p12)  }
  0x76   :  { %s498_s6 = scalar_lea.vmem %s86_s0, 16  ;;  %p503_p0 = scmp.lt.s32.totalorder %s86_s0, %s851_s21 }
  0x77   :  { %p499_p13 = scmp.ne.s32.totalorder %s86_s0, %s498_s6  ;;  %p504_p1 = scmp.lt.s32.totalorder %s875_s12, %s498_s6 }
  0x79   :  { %p505_p2 = por %p504_p1, %p503_p0 }
  0x7b   :  { %p506_p3 = pnand %p505_p2, %p499_p13 }
  0x7d   :  { %509 = shalt.err (!%p506_p3)  }
  0x7e   :  { %88 = dma.hbm_to_vmem [thread:$0]  %s76_s28, 16, %s86_s0, [#allocation2] }
  0x7f   :  { %s345_s29 = sshll.u32 %s89_s20, 5  ;;  %s811_s14 = smov [#allocation5 + $0x3]  }
  0x80   :  { %s92_s13 = sadd.s32 %s345_s29, %s90_s26  ;;  %s113_s24 = sshll.u32 %s811_s14, 4  ;;  %s114_s24 = int_to_ptr.vmem [resolvable:$true] %s113_s24 }
  0x81   :  { %s346_s15 = sshll.u32 %s92_s13, 4  ;;  %s348_s16 = sshll.u32 %s951_s18, 4 }
  0x82   :  { %s94_s27 = scalar_lea.hbm %s1174_s2, %s346_s15  ;;  %s972_s25 = scalar_lea.hbm %s1173_s1, %s348_s16 }
  0x83   :  { %s510_s6 = scalar_lea.hbm %s94_s27, 64  ;;  %p513_p5 = scmp.lt.s32.totalorder %s94_s27, %s1174_s2 }
  0x84   :  { %p511_p4 = scmp.ne.s32.totalorder %s94_s27, %s510_s6  ;;  %p514_p6 = scmp.lt.s32.totalorder %s898_s5, %s510_s6 }
  0x86   :  { %p515_p8 = por %p514_p6, %p513_p5 }
  0x88   :  { %p516_p9 = pnand %p515_p8, %p511_p4 }
  0x8a   :  { %519 = shalt.err (!%p516_p9)  }
  0x8b   :  { %s520_s20 = scalar_lea.vmem %s949_s17, 64  ;;  %p525_p12 = scmp.lt.s32.totalorder %s949_s17, %s853_s23 }
  0x8c   :  { %p521_p10 = scmp.ne.s32.totalorder %s949_s17, %s520_s20  ;;  %p526_p13 = scmp.lt.s32.totalorder %s907_s9, %s520_s20 }
  0x8e   :  { %p527_p0 = por %p526_p13, %p525_p12 }
  0x90   :  { %p528_p1 = pnand %p527_p0, %p521_p10 }
  0x92   :  { %531 = shalt.err (!%p528_p1)  }
  0x93   :  { %100 = dma.hbm_to_vmem [thread:$0]  %s94_s27, 64, %s949_s17, [#allocation2 + $0x1], %s1177_s10, %s1177_s10, %s807_s11 }
  0x94   :  { %s117_s26 = sshrl.u32 %s951_s18, 3  ;;  %s532_s29 = scalar_lea.hbm %s972_s25, 16 }
  0x95   :  { %p533_p2 = scmp.ne.s32.totalorder %s972_s25, %s532_s29  ;;  %p535_p3 = scmp.lt.s32.totalorder %s972_s25, %s1173_s1 }
  0x96   :  { %p536_p4 = scmp.lt.s32.totalorder %s866_s8, %s532_s29 }
  0x98   :  { %p537_p5 = por %p536_p4, %p535_p3 }
  0x9a   :  { %p538_p6 = pnand %p537_p5, %p533_p2 }
  0x9c   :  { %541 = shalt.err (!%p538_p6)  }
  0x9d   :  { %s542_s15 = scalar_lea.vmem %s114_s24, 16  ;;  %p547_p9 = scmp.lt.s32.totalorder %s114_s24, %s851_s21 }
  0x9e   :  { %p543_p8 = scmp.ne.s32.totalorder %s114_s24, %s542_s15  ;;  %p548_p10 = scmp.lt.s32.totalorder %s875_s12, %s542_s15 }
  0xa0   :  { %p549_p12 = por %p548_p10, %p547_p9 }
  0xa2   :  { %p550_p13 = pnand %p549_p12, %p543_p8 }
  0xa4   :  { %553 = shalt.err (!%p550_p13)  }
  0xa5   :  { %116 = dma.hbm_to_vmem [thread:$0]  %s972_s25, 16, %s114_s24, [#allocation2] }
  0xa6   :  { %s118_s17 = sand.u32 7, %s951_s18   ;;  %s349_s16 = sshll.u32 %s117_s26, 5 }
  0xa7   :  { %s120_s19 = sadd.s32 %s349_s16, %s118_s17  ;;  %s812_s27 = smov [#allocation7 + $0x3]  }
  0xa8   :  { %s350_s22 = sshll.u32 %s120_s19, 4  ;;  %s125_s30 = sshll.u32 %s812_s27, 4  ;;  %s126_s30 = int_to_ptr.vmem [resolvable:$true] %s125_s30 }
  0xa9   :  { %s122_s0 = scalar_lea.hbm %s1174_s2, %s350_s22 }
  0xaa   :  { %s554_s28 = scalar_lea.hbm %s122_s0, 64  ;;  %p557_p1 = scmp.lt.s32.totalorder %s122_s0, %s1174_s2 }
  0xab   :  { %p555_p0 = scmp.ne.s32.totalorder %s122_s0, %s554_s28  ;;  %p558_p2 = scmp.lt.s32.totalorder %s898_s5, %s554_s28 }
  0xad   :  { %p559_p3 = por %p558_p2, %p557_p1 }
  0xaf   :  { %p560_p4 = pnand %p559_p3, %p555_p0 }
  0xb1   :  { %563 = shalt.err (!%p560_p4)  }
  0xb2   :  { %s564_s18 = scalar_lea.vmem %s126_s30, 64  ;;  %p569_p6 = scmp.lt.s32.totalorder %s126_s30, %s853_s23 }
  0xb3   :  { %p565_p5 = scmp.ne.s32.totalorder %s126_s30, %s564_s18  ;;  %p570_p8 = scmp.lt.s32.totalorder %s907_s9, %s564_s18 }
  0xb5   :  { %p571_p9 = por %p570_p8, %p569_p6 }
  0xb7   :  { %p572_p10 = pnand %p571_p9, %p565_p5 }
  0xb9   :  { %575 = shalt.err (!%p572_p10)  }
  0xba   :  { %128 = dma.hbm_to_vmem [thread:$0]  %s122_s0, 64, %s126_s30, [#allocation2 + $0x1], %s1177_s10, %s1177_s10, %s807_s11 }
  0xbb   :  { %s1011_s24 = sld [smem:[#allocation4 + $0x4]]  ;;  %s813_s25 = smov [#allocation5 + $0x4]  }
  0xbc   :  { %s141_s26 = sshll.u32 %s813_s25, 4  ;;  %s814_s13 = smov [#allocation7 + $0x4]   ;;  %s142_s26 = int_to_ptr.vmem [resolvable:$true] %s141_s26 }
  0xbd   :  { %s153_s14 = sshll.u32 %s814_s13, 4  ;;  %s1015_s15 = sld [smem:[#allocation4 + $0x5]]  ;;  %s1013_s14 = int_to_ptr.vmem [resolvable:$true] %s153_s14 }
  0xbe   :  { %s815_s17 = smov [#allocation5 + $0x5]   ;;  %s816_s19 = smov [#allocation7 + $0x5]  }
  0xbf   :  { %s169_s16 = sshll.u32 %s815_s17, 4  ;;  %s1017_s22 = sshll.u32 %s816_s19, 4  ;;  %s1037_s16 = int_to_ptr.vmem [resolvable:$true] %s169_s16  ;;  %s182_s22 = int_to_ptr.vmem [resolvable:$true] %s1017_s22 }
  0xc1   :  { %s352_s27 = sshll.u32 %s1011_s24, 4  ;;  %s145_s30 = sshrl.u32 %s1011_s24, 3 }
  0xc2   :  { %s132_s0 = scalar_lea.hbm %s1173_s1, %s352_s27  ;;  %s146_s28 = sand.u32 7, %s1011_s24  }
  0xc3   :  { %s576_s20 = scalar_lea.hbm %s132_s0, 16  ;;  %p579_p13 = scmp.lt.s32.totalorder %s132_s0, %s1173_s1 }
  0xc4   :  { %p577_p12 = scmp.ne.s32.totalorder %s132_s0, %s576_s20  ;;  %p580_p0 = scmp.lt.s32.totalorder %s866_s8, %s576_s20 }
  0xc6   :  { %p581_p1 = por %p580_p0, %p579_p13 }
  0xc8   :  { %p582_p2 = pnand %p581_p1, %p577_p12 }
  0xca   :  { %585 = shalt.err (!%p582_p2)  }
  0xcb   :  { %s586_s25 = scalar_lea.vmem %s142_s26, 16  ;;  %p591_p4 = scmp.lt.s32.totalorder %s142_s26, %s851_s21 }
  0xcc   :  { %p587_p3 = scmp.ne.s32.totalorder %s142_s26, %s586_s25  ;;  %p592_p5 = scmp.lt.s32.totalorder %s875_s12, %s586_s25 }
  0xce   :  { %p593_p6 = por %p592_p5, %p591_p4 }
  0xd0   :  { %p594_p8 = pnand %p593_p6, %p587_p3 }
  0xd2   :  { %597 = shalt.err (!%p594_p8)  }
  0xd3   :  { %144 = dma.hbm_to_vmem [thread:$0]  %s132_s0, 16, %s142_s26, [#allocation2] }
  0xd4   :  { %s353_s24 = sshll.u32 %s145_s30, 5  ;;  %s356_s13 = sshll.u32 %s1015_s15, 4 }
  0xd5   :  { %s148_s17 = sadd.s32 %s353_s24, %s146_s28  ;;  %s1035_s7 = scalar_lea.hbm %s1173_s1, %s356_s13 }
  0xd6   :  { %s354_s6 = sshll.u32 %s148_s17, 4  ;;  %s173_s25 = sshrl.u32 %s1015_s15, 3 }
  0xd7   :  { %s150_s18 = scalar_lea.hbm %s1174_s2, %s354_s6 }
  0xd8   :  { %s598_s26 = scalar_lea.hbm %s150_s18, 64  ;;  %p601_p10 = scmp.lt.s32.totalorder %s150_s18, %s1174_s2 }
  0xd9   :  { %p599_p9 = scmp.ne.s32.totalorder %s150_s18, %s598_s26  ;;  %p602_p12 = scmp.lt.s32.totalorder %s898_s5, %s598_s26 }
  0xdb   :  { %p603_p13 = por %p602_p12, %p601_p10 }
  0xdd   :  { %p604_p0 = pnand %p603_p13, %p599_p9 }
  0xdf   :  { %607 = shalt.err (!%p604_p0)  }
  0xe0   :  { %s608_s30 = scalar_lea.vmem %s1013_s14, 64  ;;  %p613_p2 = scmp.lt.s32.totalorder %s1013_s14, %s853_s23 }
  0xe1   :  { %p609_p1 = scmp.ne.s32.totalorder %s1013_s14, %s608_s30  ;;  %p614_p3 = scmp.lt.s32.totalorder %s907_s9, %s608_s30 }
  0xe3   :  { %p615_p4 = por %p614_p3, %p613_p2 }
  0xe5   :  { %p616_p5 = pnand %p615_p4, %p609_p1 }
  0xe7   :  { %619 = shalt.err (!%p616_p5)  }
  0xe8   :  { %s1179_s28 = smov 128   ;;  %s620_s10 = scalar_lea.hbm %s1035_s7, 16 }
  0xe9   :  { %156 = dma.hbm_to_vmem [thread:$0]  %s150_s18, 64, %s1013_s14, [#allocation2 + $0x1], %s1179_s28, %s1179_s28, %s807_s11 }
  0xea   :  { %p621_p6 = scmp.ne.s32.totalorder %s1035_s7, %s620_s10  ;;  %p623_p8 = scmp.lt.s32.totalorder %s1035_s7, %s1173_s1 }
  0xeb   :  { %p624_p9 = scmp.lt.s32.totalorder %s866_s8, %s620_s10 }
  0xed   :  { %p625_p10 = por %p624_p9, %p623_p8 }
  0xef   :  { %p626_p12 = pnand %p625_p10, %p621_p6 }
  0xf1   :  { %629 = shalt.err (!%p626_p12)  }
  0xf2   :  { %s630_s17 = scalar_lea.vmem %s1037_s16, 16  ;;  %p635_p0 = scmp.lt.s32.totalorder %s1037_s16, %s851_s21 }
  0xf3   :  { %p631_p13 = scmp.ne.s32.totalorder %s1037_s16, %s630_s17  ;;  %p636_p1 = scmp.lt.s32.totalorder %s875_s12, %s630_s17 }
  0xf5   :  { %p637_p2 = por %p636_p1, %p635_p0 }
  0xf7   :  { %p638_p3 = pnand %p637_p2, %p631_p13 }
  0xf9   :  { %641 = shalt.err (!%p638_p3)  }
  0xfa   :  { %172 = dma.hbm_to_vmem [thread:$0]  %s1035_s7, 16, %s1037_s16, [#allocation2] }
  0xfb   :  { %s174_s14 = sand.u32 7, %s1015_s15   ;;  %s357_s19 = sshll.u32 %s173_s25, 5 }
  0xfc   :  { %s176_s27 = sadd.s32 %s357_s19, %s174_s14  ;;  %s1074_s20 = sld [smem:[#allocation4 + $0x6]] }
  0xfd   :  { %s358_s6 = sshll.u32 %s176_s27, 4 }
  0xfe   :  { %s178_s26 = scalar_lea.hbm %s1174_s2, %s358_s6 }
  0xff   :  { %s642_s0 = scalar_lea.hbm %s178_s26, 64  ;;  %p645_p5 = scmp.lt.s32.totalorder %s178_s26, %s1174_s2 }
 0x100   :  { %p643_p4 = scmp.ne.s32.totalorder %s178_s26, %s642_s0  ;;  %p646_p6 = scmp.lt.s32.totalorder %s898_s5, %s642_s0 }
 0x102   :  { %p647_p8 = por %p646_p6, %p645_p5 }
 0x104   :  { %p648_p9 = pnand %p647_p8, %p643_p4 }
 0x106   :  { %651 = shalt.err (!%p648_p9)  }
 0x107   :  { %s652_s15 = scalar_lea.vmem %s182_s22, 64  ;;  %p657_p12 = scmp.lt.s32.totalorder %s182_s22, %s853_s23 }
 0x108   :  { %p653_p10 = scmp.ne.s32.totalorder %s182_s22, %s652_s15  ;;  %p658_p13 = scmp.lt.s32.totalorder %s907_s9, %s652_s15 }
 0x10a   :  { %p659_p0 = por %p658_p13, %p657_p12 }
 0x10c   :  { %p660_p1 = pnand %p659_p0, %p653_p10 }
 0x10e   :  { %663 = shalt.err (!%p660_p1)  }
 0x10f   :  { %184 = dma.hbm_to_vmem [thread:$0]  %s178_s26, 64, %s182_s22, [#allocation2 + $0x1], %s1179_s28, %s1179_s28, %s807_s11 }
 0x110   :  { %s817_s16 = smov [#allocation5 + $0x6]   ;;  %s818_s25 = smov [#allocation7 + $0x6]  }
 0x111   :  { %s197_s7 = sshll.u32 %s817_s16, 4  ;;  %s209_s24 = sshll.u32 %s818_s25, 4  ;;  %s198_s7 = int_to_ptr.vmem [resolvable:$true] %s197_s7  ;;  %s1088_s24 = int_to_ptr.vmem [resolvable:$true] %s209_s24 }
 0x112   :  { %s1090_s13 = sld [smem:[#allocation4 + $0x7]]  ;;  %s360_s17 = sshll.u32 %s1074_s20, 4 }
 0x113   :  { %s201_s14 = sshrl.u32 %s1074_s20, 3  ;;  %s188_s6 = scalar_lea.hbm %s1173_s1, %s360_s17 }
 0x114   :  { %s202_s29 = sand.u32 7, %s1074_s20   ;;  %s664_s18 = scalar_lea.hbm %s188_s6, 16 }
 0x115   :  { %p665_p2 = scmp.ne.s32.totalorder %s188_s6, %s664_s18  ;;  %p667_p3 = scmp.lt.s32.totalorder %s188_s6, %s1173_s1 }
 0x116   :  { %p668_p4 = scmp.lt.s32.totalorder %s866_s8, %s664_s18 }
 0x118   :  { %p669_p5 = por %p668_p4, %p667_p3 }
 0x11a   :  { %p670_p6 = pnand %p669_p5, %p665_p2 }
 0x11c   :  { %673 = shalt.err (!%p670_p6)  }
 0x11d   :  { %s674_s26 = scalar_lea.vmem %s198_s7, 16  ;;  %p679_p9 = scmp.lt.s32.totalorder %s198_s7, %s851_s21 }
 0x11e   :  { %p675_p8 = scmp.ne.s32.totalorder %s198_s7, %s674_s26  ;;  %p680_p10 = scmp.lt.s32.totalorder %s875_s12, %s674_s26 }
 0x120   :  { %p681_p12 = por %p680_p10, %p679_p9 }
 0x122   :  { %p682_p13 = pnand %p681_p12, %p675_p8 }
 0x124   :  { %685 = shalt.err (!%p682_p13)  }
 0x125   :  { %200 = dma.hbm_to_vmem [thread:$0]  %s188_s6, 16, %s198_s7, [#allocation2] }
 0x126   :  { %s361_s20 = sshll.u32 %s201_s14, 5  ;;  %s819_s10 = smov [#allocation5 + $0x7]  }
 0x127   :  { %s204_s30 = sadd.s32 %s361_s20, %s202_s29  ;;  %s225_s15 = sshll.u32 %s819_s10, 4  ;;  %s226_s15 = int_to_ptr.vmem [resolvable:$true] %s225_s15 }
 0x128   :  { %s362_s16 = sshll.u32 %s204_s30, 4  ;;  %s364_s25 = sshll.u32 %s1090_s13, 4 }
 0x129   :  { %s206_s27 = scalar_lea.hbm %s1174_s2, %s362_s16  ;;  %s1111_s22 = scalar_lea.hbm %s1173_s1, %s364_s25 }
 0x12a   :  { %s686_s26 = scalar_lea.hbm %s206_s27, 64  ;;  %p689_p1 = scmp.lt.s32.totalorder %s206_s27, %s1174_s2 }
 0x12b   :  { %p687_p0 = scmp.ne.s32.totalorder %s206_s27, %s686_s26  ;;  %p690_p2 = scmp.lt.s32.totalorder %s898_s5, %s686_s26 }
 0x12d   :  { %p691_p3 = por %p690_p2, %p689_p1 }
 0x12f   :  { %p692_p4 = pnand %p691_p3, %p687_p0 }
 0x131   :  { %695 = shalt.err (!%p692_p4)  }
 0x132   :  { %s696_s14 = scalar_lea.vmem %s1088_s24, 64  ;;  %p701_p6 = scmp.lt.s32.totalorder %s1088_s24, %s853_s23 }
 0x133   :  { %p697_p5 = scmp.ne.s32.totalorder %s1088_s24, %s696_s14  ;;  %p702_p8 = scmp.lt.s32.totalorder %s907_s9, %s696_s14 }
 0x135   :  { %p703_p9 = por %p702_p8, %p701_p6 }
 0x137   :  { %p704_p10 = pnand %p703_p9, %p697_p5 }
 0x139   :  { %707 = shalt.err (!%p704_p10)  }
 0x13a   :  { %212 = dma.hbm_to_vmem [thread:$0]  %s206_s27, 64, %s1088_s24, [#allocation2 + $0x1], %s1179_s28, %s1179_s28, %s807_s11 }
 0x13b   :  { %s229_s29 = sshrl.u32 %s1090_s13, 3  ;;  %s708_s20 = scalar_lea.hbm %s1111_s22, 16 }
 0x13c   :  { %p709_p12 = scmp.ne.s32.totalorder %s1111_s22, %s708_s20  ;;  %p711_p13 = scmp.lt.s32.totalorder %s1111_s22, %s1173_s1 }
 0x13d   :  { %p712_p0 = scmp.lt.s32.totalorder %s866_s8, %s708_s20 }
 0x13f   :  { %p713_p1 = por %p712_p0, %p711_p13 }
 0x141   :  { %p714_p2 = pnand %p713_p1, %p709_p12 }
 0x143   :  { %717 = shalt.err (!%p714_p2)  }
 0x144   :  { %s718_s16 = scalar_lea.vmem %s226_s15, 16  ;;  %p723_p4 = scmp.lt.s32.totalorder %s226_s15, %s851_s21 }
 0x145   :  { %p719_p3 = scmp.ne.s32.totalorder %s226_s15, %s718_s16  ;;  %p724_p5 = scmp.lt.s32.totalorder %s875_s12, %s718_s16 }
 0x147   :  { %p725_p6 = por %p724_p5, %p723_p4 }
 0x149   :  { %p726_p8 = pnand %p725_p6, %p719_p3 }
 0x14b   :  { %729 = shalt.err (!%p726_p8)  }
 0x14c   :  { %228 = dma.hbm_to_vmem [thread:$0]  %s1111_s22, 16, %s226_s15, [#allocation2] }
 0x14d   :  { %s230_s24 = sand.u32 7, %s1090_s13   ;;  %s365_s25 = sshll.u32 %s229_s29, 5 }
 0x14e   :  { %s232_s1 = sadd.s32 %s365_s25, %s230_s24  ;;  %s820_s17 = smov [#allocation7 + $0x7]  }
 0x14f   :  { %s366_s8 = sshll.u32 %s232_s1, 4  ;;  %s237_s19 = sshll.u32 %s820_s17, 4  ;;  %s238_s19 = int_to_ptr.vmem [resolvable:$true] %s237_s19 }
 0x150   :  { %s234_s0 = scalar_lea.hbm %s1174_s2, %s366_s8 }
 0x151   :  { %s730_s26 = scalar_lea.hbm %s234_s0, 64  ;;  %p733_p10 = scmp.lt.s32.totalorder %s234_s0, %s1174_s2 }
 0x152   :  { %p731_p9 = scmp.ne.s32.totalorder %s234_s0, %s730_s26  ;;  %p734_p12 = scmp.lt.s32.totalorder %s898_s5, %s730_s26 }
 0x154   :  { %p735_p13 = por %p734_p12, %p733_p10 }
 0x156   :  { %p736_p0 = pnand %p735_p13, %p731_p9 }
 0x158   :  { %739 = shalt.err (!%p736_p0)  }
 0x159   :  { %s740_s13 = scalar_lea.vmem %s238_s19, 64  ;;  %p745_p2 = scmp.lt.s32.totalorder %s238_s19, %s853_s23 }
 0x15a   :  { %p741_p1 = scmp.ne.s32.totalorder %s238_s19, %s740_s13  ;;  %p746_p3 = scmp.lt.s32.totalorder %s907_s9, %s740_s13 }
 0x15c   :  { %p747_p4 = por %p746_p3, %p745_p2 }
 0x15e   :  { %p748_p5 = pnand %p747_p4, %p741_p1 }
 0x160   :  { %751 = shalt.err (!%p748_p5)  }
 0x161   :  { %240 = dma.hbm_to_vmem [thread:$0]  %s234_s0, 64, %s238_s19, [#allocation2 + $0x1], %s1179_s28, %s1179_s28, %s807_s11 }
 0x162   :  { %794 = dma.done.wait [#allocation2], 128 }
 0x163   :  { %795 = vsyncadd [#allocation2], 4294967168 }
 0x164   :  { %796 = dma.done.wait [#allocation2 + $0x1], 512 }
 0x165   :  { %797 = vsyncadd [#allocation2 + $0x1], 4294966784  ;;  %p753_p6 = scmp.ne.s32.totalorder %s851_s21, %s875_s12  ;;  %p758_p8 = scmp.lt.s32.totalorder %s875_s12, %s875_s12 }
 0x167   :  { %p759_p9 = por %p758_p8, %p415_p11 }
 0x169   :  { %p760_p10 = pnand %p759_p9, %p753_p6 }
 0x16b   :  { %763 = shalt.err (!%p760_p10)
}
 0x16c   :  { %256 = dma.vmem_to_hbm [thread:$0]  %s851_s21, 128, %s1175_s3, [#allocation6]  }
 0x16d   :  { %p773_p12 = scmp.ne.s32.totalorder %s853_s23, %s907_s9  ;;  %p778_p13 = scmp.lt.s32.totalorder %s907_s9, %s907_s9 }
 0x16f   :  { %p779_p0 = por %p778_p13, %p437_p7 }
 0x171   :  { %p780_p1 = pnand %p779_p0, %p773_p12 }
 0x173   :  { %783 = shalt.err (!%p780_p1)
}
 0x174   :  { %266 = dma.vmem_to_hbm [thread:$0]  %s853_s23, 512, %s1176_s4, [#allocation8]  }
 0x175   :  { %798 = dma.done.wait [#allocation6], 128  }
 0x176   :  { %799 = vsyncadd [#allocation6], 4294967168 }
 0x177   :  { %800 = dma.done.wait [#allocation8], 512  }
 0x178   :  { %801 = vsyncadd [#allocation8], 4294966784 }
 0x179   :  { %273 = vsyncpa [#allocation6], 1 }
 0x17a   :  { %274 = vsyncpa [#allocation8], 1 }
 0x17b   :  { %275 = vsyncmov [#allocation2] }
 0x17e   :  { %s276_s3 = vpop.sfrf %275 }
 0x17f   :  { %p367_p11 = scmp.ne.s32.totalorder %s276_s3, 0 }
 0x181   :  { %280 = shalt.err (%p367_p11)  }
 0x182   :  { %282 = vsyncmov [#allocation2 + $0x1] }
 0x185   :  { %s283_s21 = vpop.sfrf %282 }
 0x186   :  { %p368_p7 = scmp.ne.s32.totalorder %s283_s21, 0 }
 0x188   :  { %287 = shalt.err (%p368_p7)  }

</bundles_post_ra>
